<compile_context>
chip_gen: v6e
topology: v6e:2x2x1
jax: 0.10.0
libtpu: 0.0.40
codegen_flags: <defaults>
</compile_context>

<pallas_src>
import jax
import jax.numpy as jnp
from jax.experimental import pallas as pl
from jax.experimental.pallas import tpu as pltpu


# --------------------------------------------------------------------------
# Concrete Omniglot usage: Lambda(lambda x: x.view(x.size(0), -1))
# --------------------------------------------------------------------------
def lambda_flatten(x):
    """Row-major flatten (B, ...) -> (B, F).  Metadata-only: no kernel."""
    return x.reshape(x.shape[0], -1)


# --------------------------------------------------------------------------
# Tiling helpers
# --------------------------------------------------------------------------
def _sublane_unit(dtype):
    """Minimum sublane multiple for a dtype (packed dtypes pack along sublanes)."""
    itemsize = jnp.dtype(dtype).itemsize
    return {4: 8, 2: 16, 1: 32}.get(itemsize, 8)


def _pick_lane_width(total, sub_unit, lane_cap=8192):
    """Largest multiple-of-128 divisor of `total` (<= lane_cap), preferring a
    choice whose row count total//L is sublane-dense (multiple of sub_unit).
    Returns 0 if no lane-dense factorization exists."""
    best_any = 0
    best_dense = 0
    d = 128
    while d <= min(total, lane_cap):
        if total % d == 0:
            best_any = d
            if (total // d) % sub_unit == 0:
                best_dense = d
        d += 128
    return best_dense or best_any


def _pick_row_tile(rows, sub_unit, lanes, itemsize, tile_bytes_cap):
    """Largest multiple of sub_unit that divides `rows` and keeps the
    (tr, lanes) tile under tile_bytes_cap.  Falls back to full extent."""
    max_tr = min(rows, max(sub_unit, tile_bytes_cap // max(1, lanes * itemsize)))
    best = 0
    tr = sub_unit
    while tr <= max_tr:
        if rows % tr == 0:
            best = tr
        tr += sub_unit
    return best or rows  # full-extent block is always legal


# --------------------------------------------------------------------------
# Generic Pallas-backed Lambda(func)
# --------------------------------------------------------------------------
def make_lambda(func, *, elementwise=False, tile_bytes_cap=2 << 20):
    """Pallas-backed Lambda(func): forward(x) = func(x).

    elementwise=True  -> func is a shape-preserving elementwise map; it is
                         applied on lane/sublane-dense tiles of a 2-D slab,
                         pipelined across a grid (preferred, scales to any size).
    elementwise=False -> arbitrary jnp-traceable func applied on a single
                         whole-array VMEM block (exact semantics for any func,
                         but bounded by the scoped VMEM limit).
    """

    def _whole_array(x):
        out_aval = jax.eval_shape(func, jax.ShapeDtypeStruct(x.shape, x.dtype))

        def kernel(x_ref, o_ref):
            y = func(x_ref[...])
            o_ref[...] = y if y.dtype == o_ref.dtype else y.astype(o_ref.dtype)

        # TODO(synk): arbitrary (non-elementwise) funcs on tensors larger than
        # the scoped VMEM limit would need a func-specific tiled kernel.
        return pl.pallas_call(
            kernel,
            out_shape=jax.ShapeDtypeStruct(out_aval.shape, out_aval.dtype),
            in_specs=[pl.BlockSpec(memory_space=pltpu.MemorySpace.VMEM)],
            out_specs=pl.BlockSpec(memory_space=pltpu.MemorySpace.VMEM),
            compiler_params=pltpu.CompilerParams(vmem_limit_bytes=32 << 20),
        )(x)

    def _tiled_elementwise(x):
        out_aval = jax.eval_shape(func, jax.ShapeDtypeStruct(x.shape, x.dtype))
        if out_aval.shape != x.shape:
            # Not shape-preserving: cannot be tiled elementwise; exact fallback.
            return _whole_array(x)
        out_dtype = out_aval.dtype

        total = x.size
        sub_unit = max(_sublane_unit(x.dtype), _sublane_unit(out_dtype))
        itemsize = max(jnp.dtype(x.dtype).itemsize, jnp.dtype(out_dtype).itemsize)

        # Lane-dense slab decoupled from the batch dim.
        lanes = _pick_lane_width(total, sub_unit)
        if lanes == 0:
            return _whole_array(x)  # no multiple-of-128 factorization
        rows = total // lanes

        tr = _pick_row_tile(rows, sub_unit, lanes, itemsize, tile_bytes_cap)

        # Give v7x's second TensorCore something to do when legal.
        if rows // tr < 2 and tr % (2 * sub_unit) == 0:
            tr //= 2

        grid = (rows // tr,)
        x2 = x.reshape(rows, lanes)  # metadata-only
        bytes_accessed = total * (
            jnp.dtype(x.dtype).itemsize + jnp.dtype(out_dtype).itemsize
        )

        def kernel(x_ref, o_ref):
            y = func(x_ref[...])
            o_ref[...] = y if y.dtype == o_ref.dtype else y.astype(o_ref.dtype)

        y2 = pl.pallas_call(
            kernel,
            out_shape=jax.ShapeDtypeStruct((rows, lanes), out_dtype),
            grid=grid,
            in_specs=[pl.BlockSpec((tr, lanes), lambda i: (i, 0))],
            out_specs=pl.BlockSpec((tr, lanes), lambda i: (i, 0)),
            compiler_params=pltpu.CompilerParams(
                dimension_semantics=("parallel",),
            ),
            cost_estimate=pl.CostEstimate(
                flops=total, transcendentals=0, bytes_accessed=bytes_accessed
            ),
        )(x2)
        return y2.reshape(x.shape)  # metadata-only

    return _tiled_elementwise if elementwise else _whole_array


# --------------------------------------------------------------------------
# Demo / self-test
# --------------------------------------------------------------------------
if __name__ == "__main__":
    key = jax.random.PRNGKey(0)
    # Small NCHW feature map consistent with the Omniglot conv stack.
    x = jax.random.normal(key, (2, 4, 16, 16), dtype=jnp.float32)

    # 1) Concrete Omniglot Lambda(flatten): metadata-only reshape, no kernel.
    y = jax.block_until_ready(lambda_flatten(x))
    y_ref = x.reshape(x.shape[0], -1)
    assert y.shape == (2, 4 * 16 * 16), y.shape
    assert y.dtype == x.dtype
    assert jnp.array_equal(y, y_ref), "Lambda(flatten) output mismatch"

    # 2) Generic Pallas-backed Lambda(func) — tiled, lane/sublane-dense path.
    scale2 = make_lambda(lambda a: a * 2.0, elementwise=True)
    z = jax.block_until_ready(scale2(x))
    assert z.shape == x.shape and z.dtype == x.dtype
    assert jnp.allclose(z, x * 2.0), "Pallas Lambda(elementwise) mismatch"

    # 3) Whole-array fallback (arbitrary func, exact module semantics).
    neg = make_lambda(lambda a: -a)
    w = jax.block_until_ready(neg(x))
    assert jnp.array_equal(w, -x), "Pallas Lambda(whole-array) mismatch"

    print("KERNEL_OK")
</pallas_src>

<mosaic_0001>
module attributes {stable_mosaic.version = 11 : i64} {
  func.func @kernel(%arg0: i32, %arg1: memref<8x256xf32, #tpu.memory_space<vmem>>, %arg2: memref<8x256xf32, #tpu.memory_space<vmem>>) attributes {dimension_semantics = [#tpu.dimension_semantics<parallel>], iteration_bounds = array<i64: 1>, scalar_prefetch = 0 : i64, scratch_operands = 0 : i64, tpu.core_type = #tpu.core_type<tc>, window_params = [{transform_indices = @transform_0, window_bounds = array<i64: 8, 256>}, {transform_indices = @transform_1, window_bounds = array<i64: 8, 256>}]} {
    %c0 = arith.constant 0 : index
    %c0_0 = arith.constant 0 : index
    %0 = vector.load %arg1[%c0, %c0_0] : memref<8x256xf32, #tpu.memory_space<vmem>>, vector<8x256xf32>
    %cst = arith.constant 2.000000e+00 : f32
    %1 = vector.broadcast %cst : f32 to vector<8x256xf32>
    %2 = arith.mulf %0, %1 : vector<8x256xf32>
    %c0_1 = arith.constant 0 : index
    %c0_2 = arith.constant 0 : index
    %3 = vector.load %arg2[%c0_1, %c0_2] : memref<8x256xf32, #tpu.memory_space<vmem>>, vector<8x256xf32>
    tpu.vector_store %arg2[%c0_1, %c0_2], %2 {strides = array<i32>} : memref<8x256xf32, #tpu.memory_space<vmem>>, vector<8x256xf32>,
    return
  }
  func.func @transform_0(%arg0: i32) -> (i32, i32) {
    %c0_i32 = arith.constant 0 : i32
    %c0_i32_0 = arith.constant 0 : i32
    return %arg0, %c0_i32 : i32, i32
  }
  func.func @transform_1(%arg0: i32) -> (i32, i32) {
    %c0_i32 = arith.constant 0 : i32
    %c0_i32_0 = arith.constant 0 : i32
    return %arg0, %c0_i32 : i32, i32
  }
}

</mosaic_0001>

<bundles_post_ra>
// kernel: tpu_custom_call.1
= control target key start
LH: loop header
LB: loop body
LE: loop exit
PB: predicated region body
PF: predicated region fallthrough
CT: control target
= control target key end

     0   :  { %6 = vsyncpa [#allocation3], 0  ;;  %s106_s0 = inlined_call_operand.hbm [shape: f32[8,256], index: 0, kind: input, shape index: {}]   ;;  %s107_s1 = inlined_call_operand.hbm [shape: f32[8,256], index: 1, kind: output, shape index: {}]  }
   0x1   :  { %7 = vsyncpa [#allocation4], 0  ;;  %s88_s6 = smov [#allocation2]  }
   0x2   :  { %s14_s7 = sshll.u32 %s88_s6, 4  ;;  %s15_s7 = int_to_ptr.vmem [resolvable:$true] %s14_s7 }
   0x3   :  { %s52_s8 = scalar_lea.vmem %s15_s7, 256  ;;  %p57_p1 = scmp.lt.s32.totalorder %s15_s7, %s15_s7 }
   0x4   :  { %p53_p0 = scmp.ne.s32.totalorder %s15_s7, %s52_s8  ;;  %p58_p2 = scmp.lt.s32.totalorder %s52_s8, %s52_s8 }
   0x6   :  { %p59_p3 = por %p58_p2, %p57_p1 }
   0x8   :  { %p60_p4 = pnand %p59_p3, %p53_p0 }
   0xa   :  { %63 = shalt.err (!%p60_p4)
}
   0xb   :  { %17 = dma.hbm_to_vmem [thread:$0]  %s106_s0, 256, %s15_s7, [#allocation3]  }
   0xc   :  { %84 = dma.done.wait [#allocation3], 256  }
   0xd   :  { %85 = vsyncadd [#allocation3], 4294967040  ;;  %s89_s11 = smov [#allocation5]   ;;  %v21_v0 = vld [vmem:[#allocation2] sm:$0xff]  ;;  %v22_v1 = vld [vmem:[#allocation2 + $0x8] sm:$0xff] }
   0xe   :  { %s33_s12 = sshll.u32 %s89_s11, 4  ;;  %v23_v2 = vmul.f32 2.0, %v21_v0  ;;  %v24_v3 = vmul.f32 2.0, %v22_v1  ;;  %s34_s12 = int_to_ptr.vmem [resolvable:$true] %s33_s12 }
   0xf   :  { %s64_s13 = scalar_lea.vmem %s34_s12, 256  ;;  %p69_p6 = scmp.lt.s32.totalorder %s34_s12, %s34_s12 }
  0x10   :  { %25 = vst [vmem:[#allocation5] sm:$0xff] %v23_v2  ;;  %26 = vst [vmem:[#allocation5 + $0x8] sm:$0xff] %v24_v3  ;;  %p65_p5 = scmp.ne.s32.totalorder %s34_s12, %s64_s13  ;;  %p70_p7 = scmp.lt.s32.totalorder %s64_s13, %s64_s13 }
  0x12   :  { %p71_p8 = por %p70_p7, %p69_p6 }
  0x14   :  { %p72_p9 = pnand %p71_p8, %p65_p5 }
  0x16   :  { %75 = shalt.err (!%p72_p9)
}
  0x17   :  { %36 = dma.vmem_to_hbm [thread:$0]  %s34_s12, 256, %s107_s1, [#allocation4]  }
  0x18   :  { %86 = dma.done.wait [#allocation4], 256  }
  0x19   :  { %87 = vsyncadd [#allocation4], 4294967040 }
  0x1a   :  { %40 = vsyncpa [#allocation3], 1 }
  0x1b   :  { %41 = vsyncpa [#allocation4], 1 }

</bundles_post_ra>
